<compile_context>
chip_gen: v7x
topology: tpu7x:2x2x1
jax: 0.10.0
libtpu: 0.0.40
codegen_flags: <defaults>
</compile_context>

<pallas_src>
import jax
import jax.numpy as jnp
from jax.experimental import pallas as pl
from jax.experimental.pallas import tpu as pltpu

HIDDEN = 128            # module default hidden_dim (lane-aligned)
H2 = HIDDEN // 2
OUT_PAD = 128           # lane-dense padded output width (cols 0:3 are real)

# Packed bf16 weight-slab layout: [776, 128], all weight blocks at 128-row
# (and hence 8/16-sublane) aligned offsets.
R_W2 = 0                # conv2 weight            [128, 128]
R_W3 = 128              # conv3 weight            [128, 128]
R_WP1 = 256             # position head layer 1   [128, 128]
R_WT1 = 384             # time head layer 1       [128, 0:64]   (cols 64:128 zero)
R_WP2 = 512             # position head layer 2   [128, 0:2]    (rest zero)
R_WT2 = 640             # time head layer 2       [0:64, 2:3]   (rest zero)
R_B = 768               # bias block              [8, 128]
SLAB_ROWS = R_B + 8     # 776 (multiple of 8)


# -----------------------------------------------------------------------------
# Kernel: entire forward (3 GCN layers + fused heads) in one invocation.
# Everything is resident in VMEM; no grid (full-array blocks).
# -----------------------------------------------------------------------------
def ship_gnn_kernel(a_ref, xw1_ref, w_ref, out_ref):
    a = a_ref[...]                             # [N, N]   bf16 normalized adjacency
    H = HIDDEN

    # Static slices of the packed bf16 weight slab (row offsets 128-aligned -> free).
    w2 = w_ref[R_W2:R_W2 + H, :]               # [H, H]
    w3 = w_ref[R_W3:R_W3 + H, :]               # [H, H]
    wp1 = w_ref[R_WP1:R_WP1 + H, :]            # [H, H]
    wt1 = w_ref[R_WT1:R_WT1 + H, :]            # [H, H]  cols 0:H2 real, rest 0
    wp2 = w_ref[R_WP2:R_WP2 + H, :]            # [H, H]  cols 0:2 real, rest 0
    wt2 = w_ref[R_WT2:R_WT2 + H, :]            # [H, H]  rows 0:H2 / col 2 real, rest 0

    # One aligned 8-row load for all biases, then cheap in-register row picks.
    bias = w_ref[R_B:R_B + 8, :].astype(jnp.float32)   # [8, 128]
    b1, b2, b3 = bias[0:1, :], bias[1:2, :], bias[2:3, :]
    bp1, bt1, bo = bias[3:4, :], bias[4:5, :], bias[5:6, :]

    def agg(hb):
        # GCN aggregation: A_hat @ hb, bf16 operands, f32 accumulate.
        return jnp.dot(a, hb, preferred_element_type=jnp.float32)

    def relu_bf16(v):
        return jnp.maximum(v, 0.0).astype(jnp.bfloat16)

    def transform(hb, w):
        # Feature transform: (hb @ w) with bf16 operands, f32 accumulate, re-cast.
        return jnp.dot(hb, w, preferred_element_type=jnp.float32).astype(jnp.bfloat16)

    # conv1: x @ W1 was hoisted to the wrapper (K = in_feats is tiny / MXU-idle).
    h = relu_bf16(agg(xw1_ref[...]) + b1)                 # conv1 + ReLU (dropout = id)
    h = relu_bf16(agg(transform(h, w2)) + b2)             # conv2 + ReLU
    h = relu_bf16(agg(transform(h, w3)) + b3)             # conv3 + ReLU

    # Heads.  First layers: two 128-wide matmuls + ReLU (zero lane-padding is inert).
    hp = relu_bf16(jnp.dot(h, wp1, preferred_element_type=jnp.float32) + bp1)   # [N, 128]
    ht = relu_bf16(jnp.dot(h, wt1, preferred_element_type=jnp.float32) + bt1)   # [N, 128]
    # Fused final projections into one lane-dense [N, 128] slab:
    # cols 0:2 = position, col 2 = time, rest zero (wrapper slices [:, :3]).
    out_ref[...] = (jnp.dot(hp, wp2, preferred_element_type=jnp.float32)
                    + jnp.dot(ht, wt2, preferred_element_type=jnp.float32) + bo)


# -----------------------------------------------------------------------------
# Host-side helpers
# -----------------------------------------------------------------------------
def normalized_adjacency(edge_index, num_nodes):
    """Dense D^{-1/2}(A+I)D^{-1/2}; rows = target nodes (PyG source->target flow)."""
    src, dst = edge_index[0], edge_index[1]
    a = jnp.zeros((num_nodes, num_nodes), jnp.float32).at[dst, src].add(1.0)
    diag = jnp.diagonal(a)
    a = a + jnp.diag(jnp.where(diag > 0.0, 0.0, 1.0))   # add *remaining* self-loops
    deg = jnp.sum(a, axis=1)
    dinv = jnp.where(deg > 0, jax.lax.rsqrt(deg), 0.0)
    return dinv[:, None] * a * dinv[None, :]


def xavier_uniform(key, fan_in, fan_out):
    bound = jnp.sqrt(6.0 / (fan_in + fan_out))
    return jax.random.uniform(key, (fan_in, fan_out), jnp.float32, -bound, bound)


def make_params(key, in_feats, hidden_dim=HIDDEN):
    ks = jax.random.split(key, 7)
    h, h2 = hidden_dim, hidden_dim // 2
    z = lambda n: jnp.zeros((1, n), jnp.float32)   # module zero-inits biases
    return dict(
        w1=xavier_uniform(ks[0], in_feats, h), b1=z(h),
        w2=xavier_uniform(ks[1], h, h),        b2=z(h),
        w3=xavier_uniform(ks[2], h, h),        b3=z(h),
        wp1=xavier_uniform(ks[3], h, h),       bp1=z(h),
        wp2=xavier_uniform(ks[4], h, 2),       bp2=z(2),
        wt1=xavier_uniform(ks[5], h, h2),      bt1=z(h2),
        wt2=xavier_uniform(ks[6], h2, 1),      bt2=z(1),
    )


def pack_weight_slab(params):
    """Pack all weights/biases (except the hoisted W1) into one [776,128] bf16 slab."""
    H = HIDDEN
    slab = jnp.zeros((SLAB_ROWS, HIDDEN), jnp.float32)
    slab = slab.at[R_W2:R_W2 + H, :].set(params["w2"])
    slab = slab.at[R_W3:R_W3 + H, :].set(params["w3"])
    slab = slab.at[R_WP1:R_WP1 + H, :].set(params["wp1"])
    slab = slab.at[R_WT1:R_WT1 + H, 0:H2].set(params["wt1"])
    # fused final projections: wp2 -> cols 0:2, wt2 -> rows 0:H2 of col 2
    slab = slab.at[R_WP2:R_WP2 + H, 0:2].set(params["wp2"])
    slab = slab.at[R_WT2:R_WT2 + H2, 2:3].set(params["wt2"])
    # biases (one aligned 8-row block)
    slab = slab.at[R_B + 0, :].set(params["b1"].reshape(-1))
    slab = slab.at[R_B + 1, :].set(params["b2"].reshape(-1))
    slab = slab.at[R_B + 2, :].set(params["b3"].reshape(-1))
    slab = slab.at[R_B + 3, :].set(params["bp1"].reshape(-1))
    slab = slab.at[R_B + 4, 0:H2].set(params["bt1"].reshape(-1))
    slab = slab.at[R_B + 5, 0:2].set(params["bp2"].reshape(-1))
    slab = slab.at[R_B + 5, 2:3].set(params["bt2"].reshape(-1))
    return slab.astype(jnp.bfloat16)


def ship_gnn_forward(x, edge_index, params):
    n, _ = x.shape
    a_hat = normalized_adjacency(edge_index, n).astype(jnp.bfloat16)
    # Hoist the degenerate K=in_feats matmul into XLA; feed the kernel bf16.
    xw1 = jnp.dot(x, params["w1"],
                  precision=jax.lax.Precision.HIGHEST).astype(jnp.bfloat16)   # [N, 128]
    slab = pack_weight_slab(params)                                           # [776, 128] bf16

    def full_spec(arr):
        nd = arr.ndim
        return pl.BlockSpec(arr.shape, lambda nd=nd: (0,) * nd)  # no late binding

    flops = 2 * n * n * HIDDEN * 3 + 2 * n * HIDDEN * HIDDEN * 6
    bytes_accessed = (a_hat.size * 2 + xw1.size * 2 + slab.size * 2
                      + n * OUT_PAD * 4)
    cost = pl.CostEstimate(flops=flops, transcendentals=0,
                           bytes_accessed=bytes_accessed)

    out_padded = pl.pallas_call(
        ship_gnn_kernel,
        out_shape=jax.ShapeDtypeStruct((n, OUT_PAD), jnp.float32),
        in_specs=[full_spec(a_hat), full_spec(xw1), full_spec(slab)],
        out_specs=pl.BlockSpec((n, OUT_PAD), lambda: (0, 0)),
        compiler_params=pltpu.CompilerParams(vmem_limit_bytes=32 * 1024 * 1024),
        cost_estimate=cost,
    )(a_hat, xw1, slab)

    return out_padded[:, :3]   # [pos(2) | time(1)], same as torch.cat(..., dim=1)


def ship_gnn_reference(x, edge_index, params):
    """Plain-JAX f32 reference (highest precision) for a correctness check."""
    a = normalized_adjacency(edge_index, x.shape[0])
    hp_ = jax.lax.Precision.HIGHEST
    dot = lambda u, v: jnp.dot(u, v, precision=hp_)
    gcn = lambda h, w, b: dot(a, dot(h, w)) + b
    h = jax.nn.relu(gcn(x, params["w1"], params["b1"]))
    h = jax.nn.relu(gcn(h, params["w2"], params["b2"]))
    h = jax.nn.relu(gcn(h, params["w3"], params["b3"]))
    pos = dot(jax.nn.relu(dot(h, params["wp1"]) + params["bp1"]), params["wp2"]) + params["bp2"]
    tim = dot(jax.nn.relu(dot(h, params["wt1"]) + params["bt1"]), params["wt2"]) + params["bt2"]
    return jnp.concatenate([pos, tim], axis=1)


if __name__ == "__main__":
    key = jax.random.PRNGKey(0)
    k_x, k_e, k_p, k_b = jax.random.split(key, 4)

    num_nodes = 64
    in_feats = 8
    num_edges = 256

    x = jax.random.normal(k_x, (num_nodes, in_feats), jnp.float32)
    edge_index = jax.random.randint(k_e, (2, num_edges), 0, num_nodes, jnp.int32)
    params = make_params(k_p, in_feats, HIDDEN)

    # The module zero-inits biases; use small nonzero biases here so the packed
    # slab bias path is actually exercised by the correctness check.
    bias_names = ["b1", "b2", "b3", "bp1", "bp2", "bt1", "bt2"]
    for name, bk in zip(bias_names, jax.random.split(k_b, len(bias_names))):
        params[name] = 0.1 * jax.random.normal(bk, params[name].shape, jnp.float32)

    out = jax.block_until_ready(ship_gnn_forward(x, edge_index, params))
    ref = ship_gnn_reference(x, edge_index, params)

    assert out.shape == (num_nodes, 3), out.shape
    # bf16 MXU inputs with f32 accumulation vs. an f32 HIGHEST-precision reference.
    assert jnp.allclose(out, ref, atol=5e-2, rtol=5e-2), float(jnp.max(jnp.abs(out - ref)))

    print("KERNEL_OK")
</pallas_src>

<mosaic_0001>
module attributes {stable_mosaic.version = 11 : i64} {
  func.func @ship_gnn_kernel(%arg0: memref<64x64xbf16, #tpu.memory_space<vmem>>, %arg1: memref<64x128xbf16, #tpu.memory_space<vmem>>, %arg2: memref<776x128xbf16, #tpu.memory_space<vmem>>, %arg3: memref<64x128xf32, #tpu.memory_space<vmem>>) attributes {dimension_semantics = [], scalar_prefetch = 0 : i64, scratch_operands = 0 : i64, tpu.core_type = #tpu.core_type<tc>} {
    %c0 = arith.constant 0 : index
    %c0_0 = arith.constant 0 : index
    %0 = vector.load %arg0[%c0, %c0_0] : memref<64x64xbf16, #tpu.memory_space<vmem>>, vector<64x64xbf16>
    %c0_1 = arith.constant 0 : index
    %c0_2 = arith.constant 0 : index
    %1 = vector.load %arg2[%c0_1, %c0_2] : memref<776x128xbf16, #tpu.memory_space<vmem>>, vector<128x128xbf16>
    %c128 = arith.constant 128 : index
    %c0_3 = arith.constant 0 : index
    %2 = vector.load %arg2[%c128, %c0_3] : memref<776x128xbf16, #tpu.memory_space<vmem>>, vector<128x128xbf16>
    %c256 = arith.constant 256 : index
    %c0_4 = arith.constant 0 : index
    %3 = vector.load %arg2[%c256, %c0_4] : memref<776x128xbf16, #tpu.memory_space<vmem>>, vector<128x128xbf16>
    %c384 = arith.constant 384 : index
    %c0_5 = arith.constant 0 : index
    %4 = vector.load %arg2[%c384, %c0_5] : memref<776x128xbf16, #tpu.memory_space<vmem>>, vector<128x128xbf16>
    %c512 = arith.constant 512 : index
    %c0_6 = arith.constant 0 : index
    %5 = vector.load %arg2[%c512, %c0_6] : memref<776x128xbf16, #tpu.memory_space<vmem>>, vector<128x128xbf16>
    %c640 = arith.constant 640 : index
    %c0_7 = arith.constant 0 : index
    %6 = vector.load %arg2[%c640, %c0_7] : memref<776x128xbf16, #tpu.memory_space<vmem>>, vector<128x128xbf16>
    %c768 = arith.constant 768 : index
    %c0_8 = arith.constant 0 : index
    %7 = vector.load %arg2[%c768, %c0_8] : memref<776x128xbf16, #tpu.memory_space<vmem>>, vector<8x128xbf16>
    %8 = arith.extf %7 : vector<8x128xbf16> to vector<8x128xf32>
    %9 = vector.extract_strided_slice %8 {offsets = [0, 0], sizes = [1, 128], strides = [1, 1]} : vector<8x128xf32> to vector<1x128xf32>
    %10 = vector.extract_strided_slice %8 {offsets = [1, 0], sizes = [1, 128], strides = [1, 1]} : vector<8x128xf32> to vector<1x128xf32>
    %11 = vector.extract_strided_slice %8 {offsets = [2, 0], sizes = [1, 128], strides = [1, 1]} : vector<8x128xf32> to vector<1x128xf32>
    %12 = vector.extract_strided_slice %8 {offsets = [3, 0], sizes = [1, 128], strides = [1, 1]} : vector<8x128xf32> to vector<1x128xf32>
    %13 = vector.extract_strided_slice %8 {offsets = [4, 0], sizes = [1, 128], strides = [1, 1]} : vector<8x128xf32> to vector<1x128xf32>
    %14 = vector.extract_strided_slice %8 {offsets = [5, 0], sizes = [1, 128], strides = [1, 1]} : vector<8x128xf32> to vector<1x128xf32>
    %c0_9 = arith.constant 0 : index
    %c0_10 = arith.constant 0 : index
    %15 = vector.load %arg1[%c0_9, %c0_10] : memref<64x128xbf16, #tpu.memory_space<vmem>>, vector<64x128xbf16>
    %cst = arith.constant dense<0.000000e+00> : vector<64x128xf32>
    %16 = tpu.matmul %0, %15, %cst {dimension_numbers = #tpu.dot_dimension_numbers<[1], [0], [0], [1], [0, 0, 1, 1], [], []>} : vector<64x64xbf16>, vector<64x128xbf16>, vector<64x128xf32> -> vector<64x128xf32>
    %17 = vector.broadcast %9 : vector<1x128xf32> to vector<64x128xf32>
    %18 = arith.addf %16, %17 : vector<64x128xf32>
    %cst_11 = arith.constant 0.000000e+00 : f32
    %19 = vector.broadcast %cst_11 : f32 to vector<64x128xf32>
    %20 = arith.maximumf %18, %19 : vector<64x128xf32>
    %21 = arith.truncf %20 : vector<64x128xf32> to vector<64x128xbf16>
    %cst_12 = arith.constant dense<0.000000e+00> : vector<64x128xf32>
    %22 = tpu.matmul %21, %1, %cst_12 {dimension_numbers = #tpu.dot_dimension_numbers<[1], [0], [0], [1], [0, 0, 1, 1], [], []>} : vector<64x128xbf16>, vector<128x128xbf16>, vector<64x128xf32> -> vector<64x128xf32>
    %23 = arith.truncf %22 : vector<64x128xf32> to vector<64x128xbf16>
    %cst_13 = arith.constant dense<0.000000e+00> : vector<64x128xf32>
    %24 = tpu.matmul %0, %23, %cst_13 {dimension_numbers = #tpu.dot_dimension_numbers<[1], [0], [0], [1], [0, 0, 1, 1], [], []>} : vector<64x64xbf16>, vector<64x128xbf16>, vector<64x128xf32> -> vector<64x128xf32>
    %25 = vector.broadcast %10 : vector<1x128xf32> to vector<64x128xf32>
    %26 = arith.addf %24, %25 : vector<64x128xf32>
    %cst_14 = arith.constant 0.000000e+00 : f32
    %27 = vector.broadcast %cst_14 : f32 to vector<64x128xf32>
    %28 = arith.maximumf %26, %27 : vector<64x128xf32>
    %29 = arith.truncf %28 : vector<64x128xf32> to vector<64x128xbf16>
    %cst_15 = arith.constant dense<0.000000e+00> : vector<64x128xf32>
    %30 = tpu.matmul %29, %2, %cst_15 {dimension_numbers = #tpu.dot_dimension_numbers<[1], [0], [0], [1], [0, 0, 1, 1], [], []>} : vector<64x128xbf16>, vector<128x128xbf16>, vector<64x128xf32> -> vector<64x128xf32>
    %31 = arith.truncf %30 : vector<64x128xf32> to vector<64x128xbf16>
    %cst_16 = arith.constant dense<0.000000e+00> : vector<64x128xf32>
    %32 = tpu.matmul %0, %31, %cst_16 {dimension_numbers = #tpu.dot_dimension_numbers<[1], [0], [0], [1], [0, 0, 1, 1], [], []>} : vector<64x64xbf16>, vector<64x128xbf16>, vector<64x128xf32> -> vector<64x128xf32>
    %33 = vector.broadcast %11 : vector<1x128xf32> to vector<64x128xf32>
    %34 = arith.addf %32, %33 : vector<64x128xf32>
    %cst_17 = arith.constant 0.000000e+00 : f32
    %35 = vector.broadcast %cst_17 : f32 to vector<64x128xf32>
    %36 = arith.maximumf %34, %35 : vector<64x128xf32>
    %37 = arith.truncf %36 : vector<64x128xf32> to vector<64x128xbf16>
    %cst_18 = arith.constant dense<0.000000e+00> : vector<64x128xf32>
    %38 = tpu.matmul %37, %3, %cst_18 {dimension_numbers = #tpu.dot_dimension_numbers<[1], [0], [0], [1], [0, 0, 1, 1], [], []>} : vector<64x128xbf16>, vector<128x128xbf16>, vector<64x128xf32> -> vector<64x128xf32>
    %39 = vector.broadcast %12 : vector<1x128xf32> to vector<64x128xf32>
    %40 = arith.addf %38, %39 : vector<64x128xf32>
    %cst_19 = arith.constant 0.000000e+00 : f32
    %41 = vector.broadcast %cst_19 : f32 to vector<64x128xf32>
    %42 = arith.maximumf %40, %41 : vector<64x128xf32>
    %43 = arith.truncf %42 : vector<64x128xf32> to vector<64x128xbf16>
    %cst_20 = arith.constant dense<0.000000e+00> : vector<64x128xf32>
    %44 = tpu.matmul %37, %4, %cst_20 {dimension_numbers = #tpu.dot_dimension_numbers<[1], [0], [0], [1], [0, 0, 1, 1], [], []>} : vector<64x128xbf16>, vector<128x128xbf16>, vector<64x128xf32> -> vector<64x128xf32>
    %45 = vector.broadcast %13 : vector<1x128xf32> to vector<64x128xf32>
    %46 = arith.addf %44, %45 : vector<64x128xf32>
    %cst_21 = arith.constant 0.000000e+00 : f32
    %47 = vector.broadcast %cst_21 : f32 to vector<64x128xf32>
    %48 = arith.maximumf %46, %47 : vector<64x128xf32>
    %49 = arith.truncf %48 : vector<64x128xf32> to vector<64x128xbf16>
    %cst_22 = arith.constant dense<0.000000e+00> : vector<64x128xf32>
    %50 = tpu.matmul %43, %5, %cst_22 {dimension_numbers = #tpu.dot_dimension_numbers<[1], [0], [0], [1], [0, 0, 1, 1], [], []>} : vector<64x128xbf16>, vector<128x128xbf16>, vector<64x128xf32> -> vector<64x128xf32>
    %cst_23 = arith.constant dense<0.000000e+00> : vector<64x128xf32>
    %51 = tpu.matmul %49, %6, %cst_23 {dimension_numbers = #tpu.dot_dimension_numbers<[1], [0], [0], [1], [0, 0, 1, 1], [], []>} : vector<64x128xbf16>, vector<128x128xbf16>, vector<64x128xf32> -> vector<64x128xf32>
    %52 = arith.addf %50, %51 : vector<64x128xf32>
    %53 = vector.broadcast %14 : vector<1x128xf32> to vector<64x128xf32>
    %54 = arith.addf %52, %53 : vector<64x128xf32>
    %c0_24 = arith.constant 0 : index
    %c0_25 = arith.constant 0 : index
    %55 = vector.load %arg3[%c0_24, %c0_25] : memref<64x128xf32, #tpu.memory_space<vmem>>, vector<64x128xf32>
    tpu.vector_store %arg3[%c0_24, %c0_25], %54 {strides = array<i32>} : memref<64x128xf32, #tpu.memory_space<vmem>>, vector<64x128xf32>,
    return
  }
}

</mosaic_0001>

<bundles_post_ra>
// kernel: tpu_custom_call.1
= control target key start
LH: loop header
LB: loop body
LE: loop exit
PB: predicated region body
PF: predicated region fallthrough
CT: control target
= control target key end

     0   :  { %8 = vsyncpa [#allocation3], 0  ;;  %s1889_s0 = inlined_call_operand.hbm [shape: bf16[64,64], index: 0, kind: input, shape index: {}]   ;;  %s1890_s1 = inlined_call_operand.hbm [shape: bf16[64,128], index: 1, kind: input, shape index: {}]   ;;  %s1891_s2 = inlined_call_operand.hbm [shape: bf16[776,128], index: 2, kind: input, shape index: {}]   ;;  %s1892_s3 = inlined_call_operand.hbm [shape: f32[64,128], index: 3, kind: output, shape index: {}]  }
   0x1   :  { %9 = vsyncpa [#allocation6], 0 }
   0x2   :  { %10 = vsyncpa [#allocation4], 0  ;;  %s1749_s12 = smov [#allocation5]   ;;  %s1750_s14 = smov [#allocation2]  }
   0x3   :  { %s28_s13 = sshll.u32 %s1749_s12, 4  ;;  %s16_s15 = sshll.u32 %s1750_s14, 4  ;;  %s29_s13 = int_to_ptr.vmem [resolvable:$true] %s28_s13  ;;  %s1777_s15 = int_to_ptr.vmem [resolvable:$true] %s16_s15 }
   0x4   :  { %s1655_s18 = scalar_lea.hbm %s1890_s1, 512 }
   0x5   :  { %p1656_p0 = scmp.ne.s32.totalorder %s1890_s1, %s1655_s18  ;;  %p1659_p1 = scmp.lt.u32.totalorder %s1655_s18, %s1890_s1 }
   0x7   :  { %p1661_p2 = pnand %p1659_p1, %p1656_p0 }
   0x9   :  { %1664 = shalt.err (!%p1661_p2)
}
   0xa   :  { %s1665_s23 = scalar_lea.vmem %s29_s13, 512  ;;  %p1670_p4 = scmp.lt.s32.totalorder %s29_s13, %s29_s13 }
   0xb   :  { %p1666_p3 = scmp.ne.s32.totalorder %s29_s13, %s1665_s23  ;;  %p1671_p5 = scmp.lt.s32.totalorder %s1665_s23, %s1665_s23 }
   0xd   :  { %p1672_p6 = por %p1671_p5, %p1670_p4 }
   0xf   :  { %p1673_p7 = pnand %p1672_p6, %p1666_p3 }
  0x11   :  { %1676 = shalt.err (!%p1673_p7)
}
  0x12   :  { %s1751_s24 = smov 64   ;;  %s1752_s25 = smov 4  }
  0x13   :  { %34 = dma.hbm_to_vmem [thread:$0]  %s1890_s1, 512, %s29_s13, [#allocation6], %s1751_s24, %s1751_s24, %s1752_s25  }
  0x14   :  { %s1677_s30 = scalar_lea.hbm %s1889_s0, 512 }
  0x15   :  { %p1678_p8 = scmp.ne.s32.totalorder %s1889_s0, %s1677_s30  ;;  %p1681_p9 = scmp.lt.u32.totalorder %s1677_s30, %s1889_s0 }
  0x17   :  { %p1683_p10 = pnand %p1681_p9, %p1678_p8 }
  0x19   :  { %1686 = shalt.err (!%p1683_p10)
}
  0x1a   :  { %s1687_s8 = scalar_lea.vmem %s1777_s15, 512  ;;  %p1692_p12 = scmp.lt.s32.totalorder %s1777_s15, %s1777_s15 }
  0x1b   :  { %p1688_p11 = scmp.ne.s32.totalorder %s1777_s15, %s1687_s8  ;;  %p1693_p13 = scmp.lt.s32.totalorder %s1687_s8, %s1687_s8 }
  0x1d   :  { %p1694_p0 = por %p1693_p13, %p1692_p12 }
  0x1f   :  { %p1695_p1 = pnand %p1694_p0, %p1688_p11 }
  0x21   :  { %1698 = shalt.err (!%p1695_p1)
}
  0x22   :  { %22 = dma.hbm_to_vmem [thread:$0]  %s1889_s0, 512, %s1777_s15, [#allocation3], %s1751_s24, %s1751_s24, %s1752_s25  }
  0x23   :  { %s1753_s10 = smov [#allocation7]   ;;  %s1699_s14 = scalar_lea.hbm %s1891_s2, 6208 }
  0x24   :  { %s40_s11 = sshll.u32 %s1753_s10, 4  ;;  %p1700_p2 = scmp.ne.s32.totalorder %s1891_s2, %s1699_s14  ;;  %s41_s11 = int_to_ptr.vmem [resolvable:$true] %s40_s11 }
  0x25   :  { %p1703_p3 = scmp.lt.u32.totalorder %s1699_s14, %s1891_s2 }
  0x27   :  { %p1705_p4 = pnand %p1703_p3, %p1700_p2 }
  0x29   :  { %1708 = shalt.err (!%p1705_p4)
}
  0x2a   :  { %s1709_s20 = scalar_lea.vmem %s41_s11, 6208  ;;  %p1714_p6 = scmp.lt.s32.totalorder %s41_s11, %s41_s11 }
  0x2b   :  { %p1710_p5 = scmp.ne.s32.totalorder %s41_s11, %s1709_s20  ;;  %p1715_p7 = scmp.lt.s32.totalorder %s1709_s20, %s1709_s20 }
  0x2d   :  { %p1716_p8 = por %p1715_p7, %p1714_p6 }
  0x2f   :  { %p1717_p9 = pnand %p1716_p8, %p1710_p5 }
  0x31   :  { %1720 = shalt.err (!%p1717_p9)
}
  0x32   :  { %46 = dma.hbm_to_vmem [thread:$0]  %s1891_s2, 6208, %s41_s11, [#allocation6], %s1751_s24, %s1751_s24, %s1752_s25  }
  0x33   :  { %1743 = dma.done.wait [#allocation3], 512  }
  0x34   :  { %1744 = vsyncadd [#allocation3], 4294966784 }
  0x35   :  { %1745 = dma.done.wait [#allocation6], 6720  }
  0x36   :  { %1746 = vsyncadd [#allocation6], 4294960576  ;;  %v1599_v0 = vld [vmem:[#allocation5] sm:$0xff]   ;;  %v1600_v1 = vld [vmem:[#allocation5 + $0x8] sm:$0xff]   ;;  %vm219_vm0 = vcmask 523264   ;;  %v171_v16 = vlaneseq  ;;  %s1754_s2 = smov [#allocation8]  }
  0x37   :  { %1391 = vmatprep.subr.bf16.mxu0 %v1599_v0  ;;  %v1601_v2 = vld [vmem:[#allocation5 + $0x10] sm:$0xff]   ;;  %v1829_v3 = vld [vmem:[#allocation2] sm:$0xff]   ;;  %v1602_v4 = vld [vmem:[#allocation5 + $0x18] sm:$0xff]   ;;  %s1214_s21 = sshll.u32 %s1754_s2, 4  ;;  %s1215_s21 = int_to_ptr.vmem [resolvable:$true] %s1214_s21 }
  0x38   :  { %1392 = vmatpush3.bf16.msra.mxu0 %v1599_v0  ;;  %1399 = vmatprep.mubr.msk.bf16.mxu0 %vm219_vm0, %v1829_v3  ;;  %v1835_v5 = vld [vmem:[#allocation2 + $0x8] sm:$0xff]   ;;  %v1607_v6 = vld [vmem:[#allocation7] sm:$0xff]   ;;  %v1837_v7 = vld [vmem:[#allocation2 + $0x10] sm:$0xff]   ;;  %v1847_v17 = vshrl.u32 %v171_v16, 7  ;;  %s1721_s22 = scalar_lea.vmem %s1215_s21, 1024  ;;  %p1726_p11 = scmp.lt.s32.totalorder %s1215_s21, %s1215_s21 }
  0x39   :  { %1393 = vmatprep.subr.bf16.mxu0 %v1600_v1  ;;  %1479 = vmatprep.mubr.msk.bf16.mxu1 %vm219_vm0, %v1829_v3  ;;  %v1608_v8 = vld [vmem:[#allocation7 + $0x8] sm:$0xff]   ;;  %v1609_v9 = vld [vmem:[#allocation7 + $0x10] sm:$0xff]   ;;  %v1843_v10 = vld [vmem:[#allocation2 + $0x18] sm:$0xff]   ;;  %p1722_p10 = scmp.ne.s32.totalorder %s1215_s21, %s1721_s22  ;;  %p1727_p12 = scmp.lt.s32.totalorder %s1721_s22, %s1721_s22 }
  0x3a   :  { %v1610_v11 = vld [vmem:[#allocation7 + $0x18] sm:$0xff]   ;;  %v1611_v12 = vld [vmem:[#allocation7 + $0x20] sm:$0xff]   ;;  %v1612_v13 = vld [vmem:[#allocation7 + $0x28] sm:$0xff]   ;;  %v173_v20 = vsub.s32 0, %v1847_v17 }
  0x3b   :  { %v1613_v14 = vld [vmem:[#allocation7 + $0x30] sm:$0xff]   ;;  %v1614_v15 = vld [vmem:[#allocation7 + $0x38] sm:$0xff]   ;;  %v161_v18 = vld [vmem:[#allocation7 + $0x180] sm:$0xf]  ;;  %p1728_p13 = por %p1727_p12, %p1726_p11 }
  0x3c   :  { %1394 = vmatpush3.bf16.msra.mxu0 %v1600_v1  ;;  %v1849_v19 = vunpack.c.l.bf16 %v161_v18  ;;  %v1615_v62 = vld [vmem:[#allocation7 + $0x40] sm:$0xff]   ;;  %v1616_v63 = vld [vmem:[#allocation7 + $0x48] sm:$0xff]   ;;  %v1617_v0 = vld [vmem:[#allocation7 + $0x50] sm:$0xff]  }
  0x3d   :  { %1395 = vmatprep.subr.bf16.mxu0 %v1601_v2  ;;  %v1618_v1 = vld [vmem:[#allocation7 + $0x58] sm:$0xff]   ;;  %p1729_p0 = pnand %p1728_p13, %p1722_p10 }
  0x3e   :  { %v174_v21 = vrot.slane %v1849_v19, %v173_v20 }
  0x40   :  { %1396 = vmatpush3.bf16.msra.mxu0 %v1601_v2  ;;  %v1619_v2 = vld [vmem:[#allocation7 + $0x60] sm:$0xff]  }
  0x41   :  { %1397 = vmatprep.subr.bf16.mxu0 %v1602_v4 }
  0x44   :  { %1398 = vmatpush3.bf16.msra.mxu0 %v1602_v4  ;;  %v1621_v4 = vld [vmem:[#allocation7 + $0x70] sm:$0xff]  }
  0x45   :  { %1407 = vmatprep.subr.bf16.mxu0 %v1607_v6 }
  0x47   :  { %1400 = vmatmul.mubr.msk.bf16.vlgmr.msra.gmra.mrb[0].mxu0 %vm219_vm0, %v1835_v5 }
  0x48   :  { %1403 = vmatprep.mubr.msk.bf16.mxu0 %vm219_vm0, %v1837_v7  ;;  %1408 = vmatpush3.bf16.msra.mxu0 %v1607_v6  ;;  %v1622_v6 = vld [vmem:[#allocation7 + $0x78] sm:$0xff]  }
  0x49   :  { %1409 = vmatprep.subr.bf16.mxu0 %v1608_v8 }
  0x4c   :  { %1410 = vmatpush3.bf16.msra.mxu0 %v1608_v8  ;;  %v428_v8 = vsub.s32 1, %v1847_v17 }
  0x4d   :  { %1411 = vmatprep.subr.bf16.mxu0 %v1609_v9 }
  0x4f   :  { %1404 = vmatmul.mubr.msk.bf16.gmra.mrb[4].mxu0 %vm219_vm0, %v1843_v10 }
  0x50   :  { %1412 = vmatpush3.bf16.msra.mxu0 %v1609_v9  ;;  %v429_v9 = vrot.slane %v1849_v19, %v428_v8 }
  0x51   :  { %1413 = vmatprep.subr.bf16.mxu0 %v1610_v11 }
  0x54   :  { %1414 = vmatpush3.bf16.msra.mxu0 %v1610_v11 }
  0x55   :  { %1415 = vmatprep.subr.bf16.mxu0 %v1611_v12 }
  0x58   :  { %1416 = vmatpush3.bf16.msra.mxu0 %v1611_v12 }
  0x59   :  { %1417 = vmatprep.subr.bf16.mxu0 %v1612_v13 }
  0x5c   :  { %1418 = vmatpush3.bf16.msra.mxu0 %v1612_v13 }
  0x5d   :  { %1419 = vmatprep.subr.bf16.mxu0 %v1613_v14 }
  0x60   :  { %1420 = vmatpush3.bf16.msra.mxu0 %v1613_v14 }
  0x61   :  { %1421 = vmatprep.subr.bf16.mxu0 %v1614_v15 }
  0x64   :  { %1422 = vmatpush3.bf16.msra.mxu0 %v1614_v15 }
 0x11a   :  { %v1401_v22 = vpop.f32.mrb[0].mxu0 }
 0x11b   :  { %v275_v23 = vadd.f32 %v1401_v22, %v174_v21  ;;  %v266_v24 = vpop.f32.mrb[1].mxu0 }
 0x11c   :  { %v267_v25 = vadd.f32 %v266_v24, %v174_v21  ;;  %v1402_v26 = vpop.f32.mrb[2].mxu0 }
 0x11d   :  { %v278_v27 = vadd.f32 %v1402_v26, %v174_v21  ;;  %v269_v28 = vpop.f32.mrb[3].mxu0  ;;  %v299_v30 = vmax.f32 %v275_v23, 0.0 }
 0x11e   :  { %v270_v29 = vadd.f32 %v269_v28, %v174_v21  ;;  %v297_v32 = vmax.f32 %v267_v25, 0.0 }
 0x11f   :  { %v300_v31 = vmax.f32 %v278_v27, 0.0 }
 0x120   :  { %v298_v33 = vmax.f32 %v270_v29, 0.0 }
 0x121   :  { %v306_v34 = vpack.c.bf16 %v300_v31, %v299_v30 }
 0x122   :  { %v305_v35 = vpack.c.bf16 %v298_v33, %v297_v32  ;;  %v1405_v36 = vpop.f32.mrb[4].mxu0 }
 0x123   :  { %v291_v37 = vadd.f32 %v1405_v36, %v174_v21  ;;  %v282_v38 = vpop.f32.mrb[5].mxu0 }
 0x124   :  { %v283_v39 = vadd.f32 %v282_v38, %v174_v21  ;;  %v1406_v40 = vpop.f32.mrb[6].mxu0  ;;  %1423 = vmatprep.mubr.bf16.mxu0 %v305_v35 }
 0x125   :  { %v294_v41 = vadd.f32 %v1406_v40, %v174_v21  ;;  %v285_v42 = vpop.f32.mrb[7].mxu0  ;;  %1424 = vmatmul.mubr.bf16.vlgmr.msra.gmra.mrb[8].mxu0 %v306_v34  ;;  %v303_v44 = vmax.f32 %v291_v37, 0.0 }
 0x126   :  { %v286_v43 = vadd.f32 %v285_v42, %v174_v21  ;;  %v301_v46 = vmax.f32 %v283_v39, 0.0  ;;  %v1626_v42 = vld [vmem:[#allocation7 + $0xc8] sm:$0xff]  }
 0x127   :  { %v304_v45 = vmax.f32 %v294_v41, 0.0  ;;  %v1624_v41 = vld [vmem:[#allocation7 + $0xc0] sm:$0xff]  }
 0x128   :  { %v302_v47 = vmax.f32 %v286_v43, 0.0  ;;  %v1628_v43 = vld [vmem:[#allocation7 + $0xd0] sm:$0xff]  }
 0x129   :  { %v308_v48 = vpack.c.bf16 %v304_v45, %v303_v44  ;;  %v1630_v44 = vld [vmem:[#allocation7 + $0xd8] sm:$0xff]   ;;  %v1632_v45 = vld [vmem:[#allocation7 + $0xe0] sm:$0xff]  }
 0x12a   :  { %v307_v49 = vpack.c.bf16 %v302_v47, %v301_v46  ;;  %v1634_v46 = vld [vmem:[#allocation7 + $0xe8] sm:$0xff]  }
 0x12c   :  { %1427 = vmatprep.mubr.bf16.mxu0 %v307_v49 }
 0x12d   :  { %1428 = vmatmul.mubr.bf16.gmra.mrb[12].mxu0 %v308_v48 }
 0x12e   :  { %1439 = vmatprep.mubr.msk.bf16.mxu0 %vm219_vm0, %v1829_v3  ;;  %v1620_v3 = vld [vmem:[#allocation7 + $0x68] sm:$0xff]  }
 0x1f8   :  { %v1425_v50 = vpop.f32.mrb[8].mxu0 }
 0x1f9   :  { %v391_v51 = vpop.f32.mrb[9].mxu0 }
 0x1fa   :  { %v1426_v52 = vpop.f32.mrb[10].mxu0 }
 0x1fb   :  { %v423_v53 = vpack.c.bf16 %v1426_v52, %v1425_v50  ;;  %v394_v54 = vpop.f32.mrb[11].mxu0 }
 0x1fc   :  { %v422_v55 = vpack.c.bf16 %v394_v54, %v391_v51 }
 0x1fe   :  { %1431 = vmatprep.subr.bf16.mxu0 %v422_v55 }
 0x1ff   :  { %1432 = vmatpush3.bf16.msra.mxu0 %v422_v55 }
 0x200   :  { %v1429_v56 = vpop.f32.mrb[12].mxu0  ;;  %1433 = vmatprep.subr.bf16.mxu0 %v423_v53 }
 0x201   :  { %v407_v57 = vpop.f32.mrb[13].mxu0 }
 0x202   :  { %v1430_v58 = vpop.f32.mrb[14].mxu0 }
 0x203   :  { %v425_v59 = vpack.c.bf16 %v1430_v58, %v1429_v56  ;;  %v410_v60 = vpop.f32.mrb[15].mxu0  ;;  %1434 = vmatpush3.bf16.msra.mxu0 %v423_v53 }
 0x204   :  { %v424_v61 = vpack.c.bf16 %v410_v60, %v407_v57  ;;  %v1625_v60 = vld [vmem:[#allocation7 + $0x88] sm:$0xff]  }
 0x206   :  { %1435 = vmatprep.subr.bf16.mxu0 %v424_v61 }
 0x207   :  { %1436 = vmatpush3.bf16.msra.mxu0 %v424_v61  ;;  %v1627_v61 = vld [vmem:[#allocation7 + $0x90] sm:$0xff]  }
 0x208   :  { %1437 = vmatprep.subr.bf16.mxu0 %v425_v59 }
 0x20b   :  { %1438 = vmatpush3.bf16.msra.mxu0 %v425_v59  ;;  %v1623_v59 = vld [vmem:[#allocation7 + $0x80] sm:$0xff]  }
 0x20c   :  { %1447 = vmatprep.subr.bf16.mxu0 %v1615_v62 }
 0x20e   :  { %1440 = vmatmul.mubr.msk.bf16.vlgmr.msra.gmra.mrb[16].mxu0 %vm219_vm0, %v1835_v5 }
 0x20f   :  { %1443 = vmatprep.mubr.msk.bf16.mxu0 %vm219_vm0, %v1837_v7  ;;  %1448 = vmatpush3.bf16.msra.mxu0 %v1615_v62  ;;  %v1629_v62 = vld [vmem:[#allocation7 + $0x98] sm:$0xff]  }
 0x210   :  { %1449 = vmatprep.subr.bf16.mxu0 %v1616_v63 }
 0x213   :  { %1450 = vmatpush3.bf16.msra.mxu0 %v1616_v63  ;;  %v1631_v63 = vld [vmem:[#allocation7 + $0xa0] sm:$0xff]  }
 0x214   :  { %1451 = vmatprep.subr.bf16.mxu0 %v1617_v0 }
 0x216   :  { %1444 = vmatmul.mubr.msk.bf16.gmra.mrb[20].mxu0 %vm219_vm0, %v1843_v10 }
 0x217   :  { %1452 = vmatpush3.bf16.msra.mxu0 %v1617_v0  ;;  %v1633_v0 = vld [vmem:[#allocation7 + $0xa8] sm:$0xff]  }
 0x218   :  { %1453 = vmatprep.subr.bf16.mxu0 %v1618_v1 }
 0x21b   :  { %1454 = vmatpush3.bf16.msra.mxu0 %v1618_v1  ;;  %v1637_v1 = vld [vmem:[#allocation7 + $0xb8] sm:$0xff]  }
 0x21c   :  { %1455 = vmatprep.subr.bf16.mxu0 %v1619_v2 }
 0x21f   :  { %1456 = vmatpush3.bf16.msra.mxu0 %v1619_v2  ;;  %v1638_v2 = vld [vmem:[#allocation7 + $0xf8] sm:$0xff]  }
 0x220   :  { %1457 = vmatprep.subr.bf16.mxu0 %v1620_v3 }
 0x223   :  { %1458 = vmatpush3.bf16.msra.mxu0 %v1620_v3  ;;  %v626_v3 = vsub.s32 2, %v1847_v17 }
 0x224   :  { %1459 = vmatprep.subr.bf16.mxu0 %v1621_v4 }
 0x227   :  { %1460 = vmatpush3.bf16.msra.mxu0 %v1621_v4  ;;  %v627_v4 = vrot.slane %v1849_v19, %v626_v3 }
 0x228   :  { %1461 = vmatprep.subr.bf16.mxu0 %v1622_v6 }
 0x22b   :  { %1462 = vmatpush3.bf16.msra.mxu0 %v1622_v6 }
 0x22c   :  { %1511 = vmatprep.subr.bf16.mxu0 %v1624_v41 }
 0x2e1   :  { %v1441_v11 = vpop.f32.mrb[16].mxu0 }
 0x2e2   :  { %v473_v12 = vadd.f32 %v1441_v11, %v429_v9  ;;  %v464_v13 = vpop.f32.mrb[17].mxu0 }
 0x2e3   :  { %v465_v14 = vadd.f32 %v464_v13, %v429_v9  ;;  %v1442_v15 = vpop.f32.mrb[18].mxu0 }
 0x2e4   :  { %v476_v16 = vadd.f32 %v1442_v15, %v429_v9  ;;  %v467_v18 = vpop.f32.mrb[19].mxu0  ;;  %v497_v21 = vmax.f32 %v473_v12, 0.0 }
 0x2e5   :  { %v468_v20 = vadd.f32 %v467_v18, %v429_v9  ;;  %v495_v23 = vmax.f32 %v465_v14, 0.0 }
 0x2e6   :  { %v498_v22 = vmax.f32 %v476_v16, 0.0 }
 0x2e7   :  { %v496_v24 = vmax.f32 %v468_v20, 0.0 }
 0x2e8   :  { %v504_v25 = vpack.c.bf16 %v498_v22, %v497_v21 }
 0x2e9   :  { %v503_v26 = vpack.c.bf16 %v496_v24, %v495_v23  ;;  %v1445_v27 = vpop.f32.mrb[20].mxu0 }
 0x2ea   :  { %v489_v28 = vadd.f32 %v1445_v27, %v429_v9  ;;  %v480_v29 = vpop.f32.mrb[21].mxu0  ;;  %v1640_v27 = vld [vmem:[#allocation7 + $0x148] sm:$0xff]  }
 0x2eb   :  { %v481_v30 = vadd.f32 %v480_v29, %v429_v9  ;;  %v1446_v31 = vpop.f32.mrb[22].mxu0  ;;  %1463 = vmatprep.mubr.bf16.mxu0 %v503_v26 }
 0x2ec   :  { %v492_v32 = vadd.f32 %v1446_v31, %v429_v9  ;;  %v483_v33 = vpop.f32.mrb[23].mxu0  ;;  %1464 = vmatmul.mubr.bf16.vlgmr.msra.gmra.mrb[24].mxu0 %v504_v25  ;;  %v501_v35 = vmax.f32 %v489_v28, 0.0 }
 0x2ed   :  { %v484_v34 = vadd.f32 %v483_v33, %v429_v9  ;;  %v499_v37 = vmax.f32 %v481_v30, 0.0  ;;  %1512 = vmatpush3.bf16.msra.mxu0 %v1624_v41  ;;  %v1643_v41 = vld [vmem:[#allocation7 + $0x160] sm:$0xff]  }
 0x2ee   :  { %v502_v36 = vmax.f32 %v492_v32, 0.0  ;;  %1513 = vmatprep.subr.bf16.mxu0 %v1626_v42 }
 0x2ef   :  { %v500_v38 = vmax.f32 %v484_v34, 0.0 }
 0x2f0   :  { %v506_v39 = vpack.c.bf16 %v502_v36, %v501_v35  ;;  %v1641_v36 = vld [vmem:[#allocation7 + $0x150] sm:$0xff]  }
 0x2f1   :  { %v505_v40 = vpack.c.bf16 %v500_v38, %v499_v37  ;;  %1514 = vmatpush3.bf16.msra.mxu0 %v1626_v42  ;;  %v1644_v42 = vld [vmem:[#allocation7 + $0x168] sm:$0xff]  }
 0x2f2   :  { %1515 = vmatprep.subr.bf16.mxu0 %v1628_v43 }
 0x2f3   :  { %1467 = vmatprep.mubr.bf16.mxu0 %v505_v40  ;;  %v1642_v40 = vld [vmem:[#allocation7 + $0x158] sm:$0xff]  }
 0x2f4   :  { %1468 = vmatmul.mubr.bf16.gmra.mrb[28].mxu0 %v506_v39 }
 0x2f5   :  { %1516 = vmatpush3.bf16.msra.mxu0 %v1628_v43  ;;  %v1645_v43 = vld [vmem:[#allocation7 + $0x170] sm:$0xff]  }
 0x2f6   :  { %1517 = vmatprep.subr.bf16.mxu0 %v1630_v44 }
 0x2f9   :  { %1518 = vmatpush3.bf16.msra.mxu0 %v1630_v44  ;;  %v1646_v44 = vld [vmem:[#allocation7 + $0x178] sm:$0xff]  }
 0x2fa   :  { %1519 = vmatprep.subr.bf16.mxu0 %v1632_v45 }
 0x2fd   :  { %1520 = vmatpush3.bf16.msra.mxu0 %v1632_v45  ;;  %v1647_v45 = vld [vmem:[#allocation7 + $0x100] sm:$0xff]  }
 0x2fe   :  { %1521 = vmatprep.subr.bf16.mxu0 %v1634_v46 }
 0x301   :  { %1522 = vmatpush3.bf16.msra.mxu0 %v1634_v46  ;;  %v707_v46 = vsub.s32 3, %v1847_v17 }
 0x3bf   :  { %v1465_v47 = vpop.f32.mrb[24].mxu0 }
 0x3c0   :  { %v589_v48 = vpop.f32.mrb[25].mxu0 }
 0x3c1   :  { %v1466_v49 = vpop.f32.mrb[26].mxu0 }
 0x3c2   :  { %v621_v50 = vpack.c.bf16 %v1466_v49, %v1465_v47  ;;  %v592_v51 = vpop.f32.mrb[27].mxu0  ;;  %v836_v47 = vsub.s32 4, %v1847_v17 }
 0x3c3   :  { %v620_v52 = vpack.c.bf16 %v592_v51, %v589_v48  ;;  %v708_v48 = vrot.slane %v1849_v19, %v707_v46 }
 0x3c4   :  { %v837_v49 = vrot.slane %v1849_v19, %v836_v47  ;;  %v1650_v47 = vld [vmem:[#allocation7 + $0x118] sm:$0xff]  }
 0x3c5   :  { %1471 = vmatprep.subr.bf16.mxu1 %v620_v52 }
 0x3c6   :  { %1472 = vmatpush3.bf16.msra.mxu1 %v620_v52 }
 0x3c7   :  { %v1469_v53 = vpop.f32.mrb[28].mxu0  ;;  %1473 = vmatprep.subr.bf16.mxu1 %v621_v50 }
 0x3c8   :  { %v605_v54 = vpop.f32.mrb[29].mxu0 }
 0x3c9   :  { %v1470_v55 = vpop.f32.mrb[30].mxu0 }
 0x3ca   :  { %v623_v56 = vpack.c.bf16 %v1470_v55, %v1469_v53  ;;  %v608_v57 = vpop.f32.mrb[31].mxu0  ;;  %1474 = vmatpush3.bf16.msra.mxu1 %v621_v50 }
 0x3cb   :  { %v622_v58 = vpack.c.bf16 %v608_v57, %v605_v54 }
 0x3cd   :  { %1475 = vmatprep.subr.bf16.mxu1 %v622_v58 }
 0x3ce   :  { %1476 = vmatpush3.bf16.msra.mxu1 %v622_v58 }
 0x3cf   :  { %1477 = vmatprep.subr.bf16.mxu1 %v623_v56 }
 0x3d2   :  { %1478 = vmatpush3.bf16.msra.mxu1 %v623_v56 }
 0x3d3   :  { %1487 = vmatprep.subr.bf16.mxu1 %v1623_v59 }
 0x3d5   :  { %1480 = vmatmul.mubr.msk.bf16.vlgmr.msra.gmra.mrb[0].mxu1 %vm219_vm0, %v1835_v5  ;;  %v1635_v5 = vld [vmem:[#allocation7 + $0xb0] sm:$0xff]  }
 0x3d6   :  { %1483 = vmatprep.mubr.msk.bf16.mxu1 %vm219_vm0, %v1837_v7  ;;  %1488 = vmatpush3.bf16.msra.mxu1 %v1623_v59  ;;  %v1636_v7 = vld [vmem:[#allocation7 + $0xf0] sm:$0xff]  }
 0x3d7   :  { %1489 = vmatprep.subr.bf16.mxu1 %v1625_v60  ;;  %1523 = vmatprep.subr.bf16.mxu0 %v1636_v7 }
 0x3d8   :  { %1524 = vmatpush3.bf16.msra.mxu0 %v1636_v7 }
 0x3d9   :  { %1525 = vmatprep.subr.bf16.mxu0 %v1638_v2 }
 0x3da   :  { %1490 = vmatpush3.bf16.msra.mxu1 %v1625_v60 }
 0x3db   :  { %1491 = vmatprep.subr.bf16.mxu1 %v1627_v61 }
 0x3dc   :  { %1526 = vmatpush3.bf16.msra.mxu0 %v1638_v2 }
 0x3dd   :  { %1484 = vmatmul.mubr.msk.bf16.gmra.mrb[4].mxu1 %vm219_vm0, %v1843_v10  ;;  %v1639_v10 = vld [vmem:[#allocation7 + $0x140] sm:$0xff]  }
 0x3de   :  { %1492 = vmatpush3.bf16.msra.mxu1 %v1627_v61 }
 0x3df   :  { %1493 = vmatprep.subr.bf16.mxu1 %v1629_v62 }
 0x3e2   :  { %1494 = vmatpush3.bf16.msra.mxu1 %v1629_v62 }
 0x3e3   :  { %1495 = vmatprep.subr.bf16.mxu1 %v1631_v63 }
 0x3e6   :  { %1496 = vmatpush3.bf16.msra.mxu1 %v1631_v63 }
 0x3e7   :  { %1497 = vmatprep.subr.bf16.mxu1 %v1633_v0 }
 0x3ea   :  { %1498 = vmatpush3.bf16.msra.mxu1 %v1633_v0 }
 0x3eb   :  { %1499 = vmatprep.subr.bf16.mxu1 %v1635_v5 }
 0x3ee   :  { %1500 = vmatpush3.bf16.msra.mxu1 %v1635_v5 }
 0x3ef   :  { %1501 = vmatprep.subr.bf16.mxu1 %v1637_v1 }
 0x3f2   :  { %1502 = vmatpush3.bf16.msra.mxu1 %v1637_v1 }
 0x3f3   :  { %1535 = vmatprep.subr.bf16.mxu1 %v1639_v10 }
 0x4a8   :  { %v1481_v6 = vpop.f32.mrb[0].mxu1 }
 0x4a9   :  { %v671_v8 = vadd.f32 %v1481_v6, %v627_v4  ;;  %v662_v9 = vpop.f32.mrb[1].mxu1 }
 0x4aa   :  { %v663_v11 = vadd.f32 %v662_v9, %v627_v4  ;;  %v1482_v12 = vpop.f32.mrb[2].mxu1 }
 0x4ab   :  { %v674_v13 = vadd.f32 %v1482_v12, %v627_v4  ;;  %v665_v14 = vpop.f32.mrb[3].mxu1  ;;  %v695_v16 = vmax.f32 %v671_v8, 0.0 }
 0x4ac   :  { %v666_v15 = vadd.f32 %v665_v14, %v627_v4  ;;  %v693_v20 = vmax.f32 %v663_v11, 0.0 }
 0x4ad   :  { %v696_v18 = vmax.f32 %v674_v13, 0.0 }
 0x4ae   :  { %v694_v21 = vmax.f32 %v666_v15, 0.0 }
 0x4af   :  { %v702_v22 = vpack.c.bf16 %v696_v18, %v695_v16 }
 0x4b0   :  { %v701_v23 = vpack.c.bf16 %v694_v21, %v693_v20  ;;  %v1485_v24 = vpop.f32.mrb[4].mxu1  ;;  %v1648_v20 = vld [vmem:[#allocation7 + $0x108] sm:$0xff]  }
 0x4b1   :  { %v687_v25 = vadd.f32 %v1485_v24, %v627_v4  ;;  %v678_v26 = vpop.f32.mrb[5].mxu1 }
 0x4b2   :  { %v679_v28 = vadd.f32 %v678_v26, %v627_v4  ;;  %v1486_v29 = vpop.f32.mrb[6].mxu1  ;;  %1503 = vmatprep.mubr.bf16.mxu1 %v701_v23  ;;  %1527 = vmatprep.mubr.bf16.mxu0 %v701_v23 }
 0x4b3   :  { %v699_v30 = vmax.f32 %v687_v25, 0.0  ;;  %v690_v31 = vadd.f32 %v1486_v29, %v627_v4  ;;  %v681_v32 = vpop.f32.mrb[7].mxu1  ;;  %1504 = vmatmul.mubr.bf16.vlgmr.msra.gmra.mrb[8].mxu1 %v702_v22  ;;  %1528 = vmatmul.mubr.bf16.vlgmr.msra.gmra.mrb[32].mxu0 %v702_v22 }
 0x4b4   :  { %v697_v33 = vmax.f32 %v679_v28, 0.0  ;;  %v682_v34 = vadd.f32 %v681_v32, %v627_v4  ;;  %1536 = vmatpush3.bf16.msra.mxu1 %v1639_v10 }
 0x4b5   :  { %v700_v35 = vmax.f32 %v690_v31, 0.0  ;;  %1537 = vmatprep.subr.bf16.mxu1 %v1640_v27 }
 0x4b6   :  { %v698_v37 = vmax.f32 %v682_v34, 0.0 }
 0x4b7   :  { %v704_v38 = vpack.c.bf16 %v700_v35, %v699_v30 }
 0x4b8   :  { %v703_v39 = vpack.c.bf16 %v698_v37, %v697_v33  ;;  %1538 = vmatpush3.bf16.msra.mxu1 %v1640_v27 }
 0x4b9   :  { %1539 = vmatprep.subr.bf16.mxu1 %v1641_v36 }
 0x4ba   :  { %1531 = vmatprep.mubr.bf16.mxu0 %v703_v39  ;;  %1507 = vmatprep.mubr.bf16.mxu1 %v703_v39 }
 0x4bb   :  { %1532 = vmatmul.mubr.bf16.gmra.mrb[36].mxu0 %v704_v38  ;;  %1508 = vmatmul.mubr.bf16.gmra.mrb[12].mxu1 %v704_v38  ;;  %v1649_v38 = vld [vmem:[#allocation7 + $0x110] sm:$0xff]  }
 0x4bc   :  { %1540 = vmatpush3.bf16.msra.mxu1 %v1641_v36 }
 0x4bd   :  { %1541 = vmatprep.subr.bf16.mxu1 %v1642_v40 }
 0x4c0   :  { %1542 = vmatpush3.bf16.msra.mxu1 %v1642_v40 }
 0x4c1   :  { %1543 = vmatprep.subr.bf16.mxu1 %v1643_v41 }
 0x4c4   :  { %1544 = vmatpush3.bf16.msra.mxu1 %v1643_v41 }
 0x4c5   :  { %1545 = vmatprep.subr.bf16.mxu1 %v1644_v42 }
 0x4c8   :  { %1546 = vmatpush3.bf16.msra.mxu1 %v1644_v42 }
 0x4c9   :  { %1547 = vmatprep.subr.bf16.mxu1 %v1645_v43 }
 0x4cc   :  { %1548 = vmatpush3.bf16.msra.mxu1 %v1645_v43 }
 0x4cd   :  { %1549 = vmatprep.subr.bf16.mxu1 %v1646_v44 }
 0x4d0   :  { %1550 = vmatpush3.bf16.msra.mxu1 %v1646_v44 }
 0x4d1   :  { %1559 = vmatprep.subr.bf16.mxu1 %v1647_v45 }
 0x586   :  { %v1505_v50 = vpop.f32.mrb[8].mxu1  ;;  %v1529_v51 = vpop.f32.mrb[32].mxu0 }
 0x587   :  { %v800_v52 = vadd.f32 %v1505_v50, %v708_v48  ;;  %v929_v53 = vadd.f32 %v1529_v51, %v837_v49  ;;  %v791_v54 = vpop.f32.mrb[9].mxu1  ;;  %v920_v55 = vpop.f32.mrb[33].mxu0  ;;  %v1654_v50 = vld [vmem:[#allocation7 + $0x138] sm:$0xff]   ;;  %v1191_v51 = vsub.s32 5, %v1847_v17 }
 0x588   :  { %v792_v56 = vadd.f32 %v791_v54, %v708_v48  ;;  %v921_v57 = vadd.f32 %v920_v55, %v837_v49  ;;  %v1506_v58 = vpop.f32.mrb[10].mxu1  ;;  %v1530_v59 = vpop.f32.mrb[34].mxu0 }
 0x589   :  { %v803_v60 = vadd.f32 %v1506_v58, %v708_v48  ;;  %v932_v61 = vadd.f32 %v1530_v59, %v837_v49  ;;  %v794_v62 = vpop.f32.mrb[11].mxu1  ;;  %v923_v63 = vpop.f32.mrb[35].mxu0  ;;  %v824_v7 = vmax.f32 %v800_v52, 0.0  ;;  %v953_v1 = vmax.f32 %v929_v53, 0.0 }
 0x58a   :  { %v795_v0 = vadd.f32 %v794_v62, %v708_v48  ;;  %v924_v5 = vadd.f32 %v923_v63, %v837_v49  ;;  %v822_v3 = vmax.f32 %v792_v56, 0.0  ;;  %v951_v4 = vmax.f32 %v921_v57, 0.0 }
 0x58b   :  { %v825_v2 = vmax.f32 %v803_v60, 0.0  ;;  %v954_v10 = vmax.f32 %v932_v61, 0.0  ;;  %v1192_v52 = vrot.slane %v1849_v19, %v1191_v51 }
 0x58c   :  { %v823_v6 = vmax.f32 %v795_v0, 0.0  ;;  %v952_v8 = vmax.f32 %v924_v5, 0.0 }
 0x58d   :  { %v831_v9 = vpack.c.bf16 %v825_v2, %v824_v7  ;;  %v960_v11 = vpack.c.bf16 %v954_v10, %v953_v1 }
 0x58e   :  { %v830_v12 = vpack.c.bf16 %v823_v6, %v822_v3  ;;  %v959_v13 = vpack.c.bf16 %v952_v8, %v951_v4  ;;  %v1533_v14 = vpop.f32.mrb[36].mxu0  ;;  %v1509_v15 = vpop.f32.mrb[12].mxu1 }
 0x58f   :  { %v945_v16 = vadd.f32 %v1533_v14, %v837_v49  ;;  %v936_v18 = vpop.f32.mrb[37].mxu0  ;;  %v816_v21 = vadd.f32 %v1509_v15, %v708_v48  ;;  %v807_v22 = vpop.f32.mrb[13].mxu1 }
 0x590   :  { %v937_v23 = vadd.f32 %v936_v18, %v837_v49  ;;  %v1534_v24 = vpop.f32.mrb[38].mxu0  ;;  %1551 = vmatprep.mubr.bf16.mxu1 %v959_v13  ;;  %v808_v25 = vadd.f32 %v807_v22, %v708_v48  ;;  %v1510_v26 = vpop.f32.mrb[14].mxu1 }
 0x591   :  { %v957_v27 = vmax.f32 %v945_v16, 0.0  ;;  %v948_v28 = vadd.f32 %v1534_v24, %v837_v49  ;;  %v939_v29 = vpop.f32.mrb[39].mxu0  ;;  %1552 = vmatmul.mubr.bf16.vlgmr.msra.gmra.mrb[16].mxu1 %v960_v11  ;;  %v828_v30 = vmax.f32 %v816_v21, 0.0  ;;  %v819_v31 = vadd.f32 %v1510_v26, %v708_v48  ;;  %v810_v32 = vpop.f32.mrb[15].mxu1 }
 0x592   :  { %v955_v33 = vmax.f32 %v937_v23, 0.0  ;;  %v940_v34 = vadd.f32 %v939_v29, %v837_v49  ;;  %1560 = vmatpush3.bf16.msra.mxu1 %v1647_v45  ;;  %v826_v35 = vmax.f32 %v808_v25, 0.0  ;;  %v811_v36 = vadd.f32 %v810_v32, %v708_v48  ;;  %v1651_v45 = vld [vmem:[#allocation7 + $0x120] sm:$0xff]   ;;  %v1652_v48 = vld [vmem:[#allocation7 + $0x128] sm:$0xff]   ;;  %v1653_v49 = vld [vmem:[#allocation7 + $0x130] sm:$0xff]  }
 0x593   :  { %v958_v37 = vmax.f32 %v948_v28, 0.0  ;;  %1561 = vmatprep.subr.bf16.mxu1 %v1648_v20  ;;  %v829_v39 = vmax.f32 %v819_v31, 0.0 }
 0x594   :  { %v956_v40 = vmax.f32 %v940_v34, 0.0  ;;  %v827_v41 = vmax.f32 %v811_v36, 0.0 }
 0x595   :  { %v962_v42 = vpack.c.bf16 %v958_v37, %v957_v27  ;;  %v833_v43 = vpack.c.bf16 %v829_v39, %v828_v30 }
 0x596   :  { %v961_v44 = vpack.c.bf16 %v956_v40, %v955_v33  ;;  %1562 = vmatpush3.bf16.msra.mxu1 %v1648_v20  ;;  %v832_v46 = vpack.c.bf16 %v827_v41, %v826_v35 }
 0x597   :  { %1563 = vmatprep.subr.bf16.mxu1 %v1649_v38 }
 0x598   :  { %1555 = vmatprep.mubr.bf16.mxu1 %v961_v44 }
 0x599   :  { %1556 = vmatmul.mubr.bf16.gmra.mrb[20].mxu1 %v962_v42 }
 0x59a   :  { %1564 = vmatpush3.bf16.msra.mxu1 %v1649_v38  ;;  %1575 = vmatprep.mubr.bf16.mxu1 %v830_v12 }
 0x59b   :  { %1565 = vmatprep.subr.bf16.mxu1 %v1650_v47 }
 0x59e   :  { %1566 = vmatpush3.bf16.msra.mxu1 %v1650_v47 }
 0x59f   :  { %1567 = vmatprep.subr.bf16.mxu1 %v1651_v45 }
 0x5a2   :  { %1568 = vmatpush3.bf16.msra.mxu1 %v1651_v45 }
 0x5a3   :  { %1569 = vmatprep.subr.bf16.mxu1 %v1652_v48 }
 0x5a6   :  { %1570 = vmatpush3.bf16.msra.mxu1 %v1652_v48 }
 0x5a7   :  { %1571 = vmatprep.subr.bf16.mxu1 %v1653_v49 }
 0x5aa   :  { %1572 = vmatpush3.bf16.msra.mxu1 %v1653_v49 }
 0x5ab   :  { %1573 = vmatprep.subr.bf16.mxu1 %v1654_v50 }
 0x5ae   :  { %1574 = vmatpush3.bf16.msra.mxu1 %v1654_v50 }
 0x5b1   :  { %1576 = vmatmul.mubr.bf16.vlgmr.msra.gmra.mrb[16].mxu1 %v831_v9 }
 0x5b2   :  { %1579 = vmatprep.mubr.bf16.mxu1 %v832_v46 }
 0x5b9   :  { %1580 = vmatmul.mubr.bf16.gmra.mrb[20].mxu1 %v833_v43 }
 0x684   :  { %v1577_v53 = vpop.f32.mrb[16].mxu1 }
 0x685   :  { %v1195_v54 = vadd.f32 %v1577_v53, %v1192_v52  ;;  %v1158_v55 = vpop.f32.mrb[17].mxu1 }
 0x686   :  { %v1193_v56 = vadd.f32 %v1192_v52, %v1158_v55  ;;  %v1578_v57 = vpop.f32.mrb[18].mxu1 }
 0x687   :  { %1203 = vst [vmem:[#allocation8 + $0x10] sm:$0xff] %v1195_v54  ;;  %v1196_v58 = vadd.f32 %v1578_v57, %v1192_v52  ;;  %v1161_v59 = vpop.f32.mrb[19].mxu1 }
 0x688   :  { %1201 = vst [vmem:[#allocation8] sm:$0xff] %v1193_v56  ;;  %v1194_v60 = vadd.f32 %v1192_v52, %v1161_v59 }
 0x689   :  { %1204 = vst [vmem:[#allocation8 + $0x18] sm:$0xff] %v1196_v58 }
 0x68a   :  { %1202 = vst [vmem:[#allocation8 + $0x8] sm:$0xff] %v1194_v60 }
 0x68c   :  { %v1581_v61 = vpop.f32.mrb[20].mxu1 }
 0x68d   :  { %v1199_v62 = vadd.f32 %v1581_v61, %v1192_v52  ;;  %v1174_v63 = vpop.f32.mrb[21].mxu1 }
 0x68e   :  { %v1197_v17 = vadd.f32 %v1192_v52, %v1174_v63  ;;  %v1582_v0 = vpop.f32.mrb[22].mxu1 }
 0x68f   :  { %1207 = vst [vmem:[#allocation8 + $0x30] sm:$0xff] %v1199_v62  ;;  %v1200_v19 = vadd.f32 %v1582_v0, %v1192_v52  ;;  %v1177_v5 = vpop.f32.mrb[23].mxu1 }
 0x690   :  { %1205 = vst [vmem:[#allocation8 + $0x20] sm:$0xff] %v1197_v17  ;;  %v1198_v7 = vadd.f32 %v1192_v52, %v1177_v5 }
 0x691   :  { %1208 = vst [vmem:[#allocation8 + $0x38] sm:$0xff] %v1200_v19 }
 0x692   :  { %1206 = vst [vmem:[#allocation8 + $0x28] sm:$0xff] %v1198_v7 }
 0x693   :  { %1732 = shalt.err (!%p1729_p0)
}
 0x694   :  { %s1733_s25 = scalar_lea.hbm %s1892_s3, 1024 }
 0x695   :  { %p1734_p1 = scmp.ne.s32.totalorder %s1892_s3, %s1733_s25  ;;  %p1737_p2 = scmp.lt.u32.totalorder %s1733_s25, %s1892_s3 }
 0x697   :  { %p1739_p3 = pnand %p1737_p2, %p1734_p1 }
 0x699   :  { %1742 = shalt.err (!%p1739_p3)
}
 0x69a   :  { %s1755_s30 = smov 128   ;;  %s1756_s4 = smov 8  }
 0x69b   :  { %1220 = dma.vmem_to_hbm [thread:$0]  %s1215_s21, 1024, %s1892_s3, [#allocation4], %s1755_s30, %s1755_s30, %s1756_s4  }
 0x69c   :  { %1747 = dma.done.wait [#allocation4], 1024  }
 0x69d   :  { %1748 = vsyncadd [#allocation4], 4294966272 }
 0x69e   :  { %1224 = vsyncpa [#allocation3], 1 }
 0x69f   :  { %1225 = vsyncpa [#allocation6], 1 }
 0x6a0   :  { %1226 = vsyncpa [#allocation4], 1 }

</bundles_post_ra>
